<compile_context>
chip_gen: v7x
topology: tpu7x:2x2x1
jax: 0.10.0
libtpu: 0.0.40
codegen_flags: <defaults>
</compile_context>

<pallas_src>
import numpy as np
import jax
import jax.numpy as jnp
from jax.experimental import pallas as pl
from jax.experimental.pallas import tpu as pltpu


# ------------------------------------------------------------------ matrices
def adaptive_pool_matrix(out_size: int, in_size: int) -> np.ndarray:
    """Exact AdaptiveAvgPool1d as a (out_size, in_size) averaging matrix."""
    P = np.zeros((out_size, in_size), np.float32)
    for i in range(out_size):
        start = (i * in_size) // out_size
        end = -((-(i + 1) * in_size) // out_size)  # ceil((i+1)*in/out)
        P[i, start:end] = 1.0 / float(end - start)
    return P


def bilinear_matrix(out_size: int, in_size: int) -> np.ndarray:
    """Bilinear (align_corners=True) 1-D upsample as (out_size, in_size) matrix."""
    U = np.zeros((out_size, in_size), np.float32)
    if in_size == 1:
        U[:, 0] = 1.0
        return U
    for y in range(out_size):
        src = y * (in_size - 1) / (out_size - 1) if out_size > 1 else 0.0
        i0 = min(int(np.floor(src)), in_size - 2)
        frac = src - i0
        U[y, i0] = 1.0 - frac
        U[y, i0 + 1] = frac
    return U


# ------------------------------------------------------------------ kernel
def ppm_fused_kernel(x_ref, mpoolT_ref, wT_ref, bias_ref, mask_ref, mupT_ref,
                     out_ref):
    """Fused PPM forward for one batch element (grid = (N,)).

      x_ref:      (1, Cin, HW)        NCHW-flat input slab (f32)
      mpoolT_ref: (HW, B2)            stacked adaptive-pool matrices, transposed
      wT_ref:     (NBCout, Cin)       per-branch 1x1 conv weights (BN scale folded)
      bias_ref:   (NBCout, B2)        folded BN bias (f32), branch block layout
      mask_ref:   (NBCout, B2)        1 where row-branch == col-branch, else 0
      mupT_ref:   (B2, HW)            stacked bilinear upsample matrices, transposed
      out_ref:    (1, Cin+NBCout, HW) concat([x, upsampled branches], channel axis)
    """
    cdt = mpoolT_ref.dtype
    cin = x_ref.shape[1]

    x = x_ref[0]                                                   # (Cin, HW) f32

    # Adaptive average pool of ALL branches in one matmul: (Cin, B2).
    pooled = jnp.dot(x.astype(cdt), mpoolT_ref[...],
                     preferred_element_type=jnp.float32)

    # 1x1 conv (BN scale folded into wT) + bias + ReLU; cross-branch terms
    # produced by the fused matmul are zeroed by the block mask.
    y = jnp.dot(wT_ref[...], pooled.astype(cdt),
                preferred_element_type=jnp.float32)                # (NBCout, B2)
    y = jnp.maximum(y + bias_ref[...], 0.0) * mask_ref[...]

    # Bilinear (align_corners=True) upsample of all branches: (NBCout, HW).
    up = jnp.dot(y.astype(cdt), mupT_ref[...],
                 preferred_element_type=jnp.float32)

    # Channel concat with the identity path, done in-kernel (lane-dense store;
    # the identity channels stay exact f32 copies of x).
    out_ref[0, :cin, :] = x.astype(out_ref.dtype)
    out_ref[0, cin:, :] = up.astype(out_ref.dtype)


# ------------------------------------------------------------------ host-side operand construction (done once)
def build_ppm_operands(params, bin_sizes, in_channels, H, W,
                       compute_dtype=jnp.float32):
    """Precompute fused pool/upsample matrices, folded conv weights, bias, mask."""
    HW = H * W
    NB = len(bin_sizes)
    Cout = params[0][0].shape[1]
    B2 = int(sum(b * b for b in bin_sizes))
    NBCout = NB * Cout

    m_poolT = np.concatenate(
        [np.kron(adaptive_pool_matrix(b, H), adaptive_pool_matrix(b, W)).T
         for b in bin_sizes], axis=1).astype(np.float32)           # (HW, B2)

    m_upT = np.zeros((B2, HW), np.float32)                         # (B2, HW)
    w_allT = np.zeros((NBCout, in_channels), np.float32)           # (NBCout, Cin)
    bias_all = np.zeros((NBCout, B2), np.float32)
    mask = np.zeros((NBCout, B2), np.float32)

    r, c = 0, 0
    for (Wc, scale, bias), b in zip(params, bin_sizes):
        bb = b * b
        m_upT[r:r + bb, :] = np.kron(bilinear_matrix(H, b),
                                     bilinear_matrix(W, b)).T
        w_allT[c:c + Cout, :] = (np.asarray(Wc, np.float32)
                                 * np.asarray(scale, np.float32)[None, :]).T
        bias_all[c:c + Cout, r:r + bb] = np.asarray(bias, np.float32)[:, None]
        mask[c:c + Cout, r:r + bb] = 1.0
        r += bb
        c += Cout

    return {
        "m_poolT": jnp.asarray(m_poolT, compute_dtype),
        "m_upT": jnp.asarray(m_upT, compute_dtype),
        "w_allT": jnp.asarray(w_allT, compute_dtype),
        "bias_all": jnp.asarray(bias_all, jnp.float32),
        "mask": jnp.asarray(mask, jnp.float32),
    }


# ------------------------------------------------------------------ wrapper
def pyramid_pooling_forward(x_nchw, ops):
    N, Cin, H, W = x_nchw.shape
    HW = H * W
    cdt = ops["m_poolT"].dtype
    NBCout, B2 = ops["mask"].shape
    Ctot = Cin + NBCout
    isz = jnp.dtype(cdt).itemsize

    x_flat = x_nchw.reshape(N, Cin, HW).astype(jnp.float32)

    cost = pl.CostEstimate(
        flops=int(2 * N * (Cin * HW * B2 + NBCout * Cin * B2 + NBCout * B2 * HW)),
        transcendentals=0,
        bytes_accessed=int(4 * N * (Cin * HW + Ctot * HW)
                           + isz * (2 * HW * B2 + NBCout * Cin)
                           + 4 * 2 * NBCout * B2))

    out_flat = pl.pallas_call(
        ppm_fused_kernel,
        out_shape=jax.ShapeDtypeStruct((N, Ctot, HW), jnp.float32),
        grid=(N,),
        in_specs=[
            pl.BlockSpec((1, Cin, HW), lambda n: (n, 0, 0)),
            pl.BlockSpec((HW, B2), lambda n: (0, 0)),
            pl.BlockSpec((NBCout, Cin), lambda n: (0, 0)),
            pl.BlockSpec((NBCout, B2), lambda n: (0, 0)),
            pl.BlockSpec((NBCout, B2), lambda n: (0, 0)),
            pl.BlockSpec((B2, HW), lambda n: (0, 0)),
        ],
        out_specs=pl.BlockSpec((1, Ctot, HW), lambda n: (n, 0, 0)),
        compiler_params=pltpu.CompilerParams(
            dimension_semantics=("parallel",),
            vmem_limit_bytes=32 * 1024 * 1024),
        cost_estimate=cost,
    )(x_flat, ops["m_poolT"], ops["w_allT"], ops["bias_all"], ops["mask"],
      ops["m_upT"])

    return out_flat.reshape(N, Ctot, H, W)


# ------------------------------------------------------------------ pure-JAX reference (independent, per-branch)
def pyramid_pooling_reference(x_nchw, params, bin_sizes):
    N, Cin, H, W = x_nchw.shape
    x_flat = jnp.transpose(x_nchw, (0, 2, 3, 1)).reshape(N, H * W, Cin)
    x_flat = x_flat.astype(jnp.float32)
    outs = [x_nchw]
    for (Wc, scale, bias), b in zip(params, bin_sizes):
        Cout = Wc.shape[1]
        m_pool = jnp.asarray(
            np.kron(adaptive_pool_matrix(b, H), adaptive_pool_matrix(b, W)),
            jnp.float32)
        m_up = jnp.asarray(
            np.kron(bilinear_matrix(H, b), bilinear_matrix(W, b)), jnp.float32)
        w_f = Wc * scale[None, :]                 # BN (eval) scale folded
        pooled = jnp.einsum('ps,nsc->npc', m_pool, x_flat)
        y = jnp.maximum(jnp.einsum('npc,co->npo', pooled, w_f) + bias, 0.0)
        up = jnp.einsum('sp,npo->nso', m_up, y)
        outs.append(jnp.transpose(up.reshape(N, H, W, Cout), (0, 3, 1, 2)))
    return jnp.concatenate(outs, axis=1)


# ------------------------------------------------------------------ main
if __name__ == "__main__":
    N, Cin, H, W = 2, 4, 16, 16
    Cout = 4
    bin_sizes = (1, 2, 3, 6)
    eps = 1e-5

    key = jax.random.PRNGKey(0)
    kx, *kws = jax.random.split(key, 1 + len(bin_sizes))
    x = jax.random.normal(kx, (N, Cin, H, W), dtype=jnp.float32)

    # Per-branch params: 1x1 conv weight (no bias) + BatchNorm2d in eval mode
    # (PyTorch default init: gamma=1, beta=0, running_mean=0, running_var=1).
    params = []
    for kw in kws:
        conv_w = jax.random.normal(kw, (Cout, Cin), dtype=jnp.float32) / np.sqrt(Cin)
        Wc = conv_w.T                                   # (Cin, Cout): pooled @ Wc
        gamma = jnp.ones((Cout,), jnp.float32)
        beta = jnp.zeros((Cout,), jnp.float32)
        running_mean = jnp.zeros((Cout,), jnp.float32)
        running_var = jnp.ones((Cout,), jnp.float32)
        scale = gamma / jnp.sqrt(running_var + eps)
        bias = beta - running_mean * scale
        params.append((Wc, scale, bias))

    ref = jax.block_until_ready(pyramid_pooling_reference(x, params, bin_sizes))

    fwd = jax.jit(pyramid_pooling_forward)

    # float32 operands: tight numerical check against the pure-JAX reference.
    ops_f32 = build_ppm_operands(params, bin_sizes, Cin, H, W, jnp.float32)
    out = jax.block_until_ready(fwd(x, ops_f32))
    assert out.shape == (N, Cin + len(bin_sizes) * Cout, H, W), out.shape
    np.testing.assert_allclose(np.asarray(out), np.asarray(ref),
                               rtol=1e-4, atol=1e-5)

    # bfloat16 matmul operands (v6e/v7x MXU-friendly), f32 accumulation and an
    # exact f32 identity path: loose check.
    ops_bf16 = build_ppm_operands(params, bin_sizes, Cin, H, W, jnp.bfloat16)
    out_bf16 = jax.block_until_ready(fwd(x, ops_bf16))
    np.testing.assert_allclose(np.asarray(out_bf16), np.asarray(ref),
                               rtol=5e-2, atol=5e-2)

    print("KERNEL_OK")
</pallas_src>

<mosaic_0001>
module attributes {stable_mosaic.version = 11 : i64} {
  func.func @ppm_fused_kernel(%arg0: i32, %arg1: memref<1x4x256xf32, #tpu.memory_space<vmem>>, %arg2: memref<256x50xf32, #tpu.memory_space<vmem>>, %arg3: memref<16x4xf32, #tpu.memory_space<vmem>>, %arg4: memref<16x50xf32, #tpu.memory_space<vmem>>, %arg5: memref<16x50xf32, #tpu.memory_space<vmem>>, %arg6: memref<50x256xf32, #tpu.memory_space<vmem>>, %arg7: memref<1x20x256xf32, #tpu.memory_space<vmem>>) attributes {dimension_semantics = [#tpu.dimension_semantics<parallel>], iteration_bounds = array<i64: 2>, scalar_prefetch = 0 : i64, scratch_operands = 0 : i64, tpu.core_type = #tpu.core_type<tc>, window_params = [{transform_indices = @transform_0, window_bounds = array<i64: 1, 4, 256>}, {pipeline_mode = #tpu.pipeline_mode<synchronous>, transform_indices = @transform_1, window_bounds = array<i64: 256, 50>}, {pipeline_mode = #tpu.pipeline_mode<synchronous>, transform_indices = @transform_2, window_bounds = array<i64: 16, 4>}, {pipeline_mode = #tpu.pipeline_mode<synchronous>, transform_indices = @transform_3, window_bounds = array<i64: 16, 50>}, {pipeline_mode = #tpu.pipeline_mode<synchronous>, transform_indices = @transform_4, window_bounds = array<i64: 16, 50>}, {pipeline_mode = #tpu.pipeline_mode<synchronous>, transform_indices = @transform_5, window_bounds = array<i64: 50, 256>}, {transform_indices = @transform_6, window_bounds = array<i64: 1, 20, 256>}]} {
    %c0 = arith.constant 0 : index
    %c0_0 = arith.constant 0 : index
    %c0_1 = arith.constant 0 : index
    %0 = vector.load %arg1[%c0, %c0_0, %c0_1] : memref<1x4x256xf32, #tpu.memory_space<vmem>>, vector<1x4x256xf32>
    %1 = vector.shape_cast %0 : vector<1x4x256xf32> to vector<4x256xf32>
    %c0_2 = arith.constant 0 : index
    %c0_3 = arith.constant 0 : index
    %2 = vector.load %arg2[%c0_2, %c0_3] : memref<256x50xf32, #tpu.memory_space<vmem>>, vector<256x50xf32>
    %cst = arith.constant dense<0.000000e+00> : vector<4x50xf32>
    %3 = tpu.matmul %1, %2, %cst {dimension_numbers = #tpu.dot_dimension_numbers<[1], [0], [0], [1], [0, 0, 1, 1], [], []>} : vector<4x256xf32>, vector<256x50xf32>, vector<4x50xf32> -> vector<4x50xf32>
    %c0_4 = arith.constant 0 : index
    %c0_5 = arith.constant 0 : index
    %4 = vector.load %arg3[%c0_4, %c0_5] : memref<16x4xf32, #tpu.memory_space<vmem>>, vector<16x4xf32>
    %cst_6 = arith.constant dense<0.000000e+00> : vector<16x50xf32>
    %5 = tpu.matmul %4, %3, %cst_6 {dimension_numbers = #tpu.dot_dimension_numbers<[1], [0], [0], [1], [0, 0, 1, 1], [], []>} : vector<16x4xf32>, vector<4x50xf32>, vector<16x50xf32> -> vector<16x50xf32>
    %c0_7 = arith.constant 0 : index
    %c0_8 = arith.constant 0 : index
    %6 = vector.load %arg4[%c0_7, %c0_8] : memref<16x50xf32, #tpu.memory_space<vmem>>, vector<16x50xf32>
    %7 = arith.addf %5, %6 : vector<16x50xf32>
    %cst_9 = arith.constant 0.000000e+00 : f32
    %8 = vector.broadcast %cst_9 : f32 to vector<16x50xf32>
    %9 = arith.maximumf %7, %8 : vector<16x50xf32>
    %c0_10 = arith.constant 0 : index
    %c0_11 = arith.constant 0 : index
    %10 = vector.load %arg5[%c0_10, %c0_11] : memref<16x50xf32, #tpu.memory_space<vmem>>, vector<16x50xf32>
    %11 = arith.mulf %9, %10 : vector<16x50xf32>
    %c0_12 = arith.constant 0 : index
    %c0_13 = arith.constant 0 : index
    %12 = vector.load %arg6[%c0_12, %c0_13] : memref<50x256xf32, #tpu.memory_space<vmem>>, vector<50x256xf32>
    %cst_14 = arith.constant dense<0.000000e+00> : vector<16x256xf32>
    %13 = tpu.matmul %11, %12, %cst_14 {dimension_numbers = #tpu.dot_dimension_numbers<[1], [0], [0], [1], [0, 0, 1, 1], [], []>} : vector<16x50xf32>, vector<50x256xf32>, vector<16x256xf32> -> vector<16x256xf32>
    %c0_15 = arith.constant 0 : index
    %c0_16 = arith.constant 0 : index
    %c0_17 = arith.constant 0 : index
    %14 = vector.load %arg7[%c0_15, %c0_16, %c0_17] : memref<1x20x256xf32, #tpu.memory_space<vmem>>, vector<1x4x256xf32>
    %15 = vector.shape_cast %14 : vector<1x4x256xf32> to vector<4x256xf32>
    %16 = vector.shape_cast %1 : vector<4x256xf32> to vector<1x4x256xf32>
    tpu.vector_store %arg7[%c0_15, %c0_16, %c0_17], %16 {strides = array<i32>} : memref<1x20x256xf32, #tpu.memory_space<vmem>>, vector<1x4x256xf32>,
    %c0_18 = arith.constant 0 : index
    %c4 = arith.constant 4 : index
    %c0_19 = arith.constant 0 : index
    %17 = vector.load %arg7[%c0_18, %c4, %c0_19] : memref<1x20x256xf32, #tpu.memory_space<vmem>>, vector<1x16x256xf32>
    %18 = vector.shape_cast %17 : vector<1x16x256xf32> to vector<16x256xf32>
    %19 = vector.shape_cast %13 : vector<16x256xf32> to vector<1x16x256xf32>
    tpu.vector_store %arg7[%c0_18, %c4, %c0_19], %19 {strides = array<i32>} : memref<1x20x256xf32, #tpu.memory_space<vmem>>, vector<1x16x256xf32>,
    return
  }
  func.func @transform_0(%arg0: i32) -> (i32, i32, i32) {
    %c0_i32 = arith.constant 0 : i32
    %c0_i32_0 = arith.constant 0 : i32
    %c0_i32_1 = arith.constant 0 : i32
    return %arg0, %c0_i32, %c0_i32_0 : i32, i32, i32
  }
  func.func @transform_1(%arg0: i32) -> (i32, i32) {
    %c0_i32 = arith.constant 0 : i32
    %c0_i32_0 = arith.constant 0 : i32
    %c0_i32_1 = arith.constant 0 : i32
    return %c0_i32, %c0_i32_0 : i32, i32
  }
  func.func @transform_2(%arg0: i32) -> (i32, i32) {
    %c0_i32 = arith.constant 0 : i32
    %c0_i32_0 = arith.constant 0 : i32
    %c0_i32_1 = arith.constant 0 : i32
    return %c0_i32, %c0_i32_0 : i32, i32
  }
  func.func @transform_3(%arg0: i32) -> (i32, i32) {
    %c0_i32 = arith.constant 0 : i32
    %c0_i32_0 = arith.constant 0 : i32
    %c0_i32_1 = arith.constant 0 : i32
    return %c0_i32, %c0_i32_0 : i32, i32
  }
  func.func @transform_4(%arg0: i32) -> (i32, i32) {
    %c0_i32 = arith.constant 0 : i32
    %c0_i32_0 = arith.constant 0 : i32
    %c0_i32_1 = arith.constant 0 : i32
    return %c0_i32, %c0_i32_0 : i32, i32
  }
  func.func @transform_5(%arg0: i32) -> (i32, i32) {
    %c0_i32 = arith.constant 0 : i32
    %c0_i32_0 = arith.constant 0 : i32
    %c0_i32_1 = arith.constant 0 : i32
    return %c0_i32, %c0_i32_0 : i32, i32
  }
  func.func @transform_6(%arg0: i32) -> (i32, i32, i32) {
    %c0_i32 = arith.constant 0 : i32
    %c0_i32_0 = arith.constant 0 : i32
    %c0_i32_1 = arith.constant 0 : i32
    return %arg0, %c0_i32, %c0_i32_0 : i32, i32, i32
  }
}

</mosaic_0001>

<bundles_post_ra>
// kernel: pyramid_pooling_forward.1
= control target key start
LH: loop header
LB: loop body
LE: loop exit
PB: predicated region body
PF: predicated region fallthrough
CT: control target
= control target key end

     0   :  { %s798_s21 = smov 0   ;;  %s987_s0 = inlined_call_operand.vmem [shape: f32[2,4,256], index: 0, kind: input, shape index: {}]   ;;  %s988_s1 = inlined_call_operand.vmem [shape: f32[256,50], index: 1, kind: input, shape index: {}]   ;;  %s989_s2 = inlined_call_operand.vmem [shape: f32[16,4], index: 2, kind: input, shape index: {}]   ;;  %s990_s3 = inlined_call_operand.vmem [shape: f32[16,50], index: 3, kind: input, shape index: {}]   ;;  %s991_s4 = inlined_call_operand.vmem [shape: f32[16,50], index: 4, kind: input, shape index: {}]   ;;  %s992_s5 = inlined_call_operand.vmem [shape: f32[50,256], index: 5, kind: input, shape index: {}]   ;;  %s993_s6 = inlined_call_operand.vmem [shape: f32[2,20,256], index: 6, kind: output, shape index: {}]  }
   0x1 LB: > { %s638_s22 = sadd.s32 4294967295, %s760_s21   ;;  %p642_p0 = scmp.ge.s32.totalorder %s760_s21, 1  ;;  %s760_s21 = sphi %s798_s21, %s16_s21  }
   0x2   : > { %p212_p1 = scmp.lt.s32.totalorder %s760_s21, 3 }
   0x4   : > { %p213_p2 = pnand %p642_p0, %p212_p1 }
   0x5   : > { %v269_v0 = vld [vmem:[%s988_s1 + $0x80] sm:$0xff] (!%p213_p2)  ;;  %v270_v1 = vld [vmem:[%s988_s1 + $0x88] sm:$0xff] (!%p213_p2)  ;;  %p242_p3 = scmp.lt.s32.totalorder (!%p213_p2), %s638_s22, 1  ;;  %v271_v5 = vld [vmem:[%s988_s1 + $0x90] sm:$0xff] (!%p213_p2)  ;;  %vm362_vm0 = vcmask (!%p213_p2), 31744   ;;  %vm369_vm1 = vcmask (!%p213_p2), 1043456  }
   0x6   : > { %216 = sbr.rel (%p213_p2) target bundleno = 697 (0x2b9), region = 44  ;;  %v253_v2 = vld [vmem:[%s988_s1] sm:$0xff] (!%p213_p2)  ;;  %v699_v3 = vpack.c.bf16 (!%p213_p2), %v270_v1, %v269_v0  ;;  %v254_v4 = vld [vmem:[%s988_s1 + $0x8] sm:$0xff] (!%p213_p2)  ;;  %v272_v6 = vld [vmem:[%s988_s1 + $0x98] sm:$0xff] (!%p213_p2)  ;;  %vm475_vm2 = vcmask (!%p213_p2), 1041408   ;;  %vm468_vm3 = vcmask (!%p213_p2), 408576  }
   0x7   : > { %v701_v7 = vpack.c.bf16 (!%p213_p2), %v254_v4, %v253_v2  ;;  %v703_v8 = vpack.c.bf16 (!%p213_p2), %v272_v6, %v271_v5  ;;  %v255_v9 = vld [vmem:[%s988_s1 + $0x10] sm:$0xff] (!%p213_p2)  ;;  %v256_v10 = vld [vmem:[%s988_s1 + $0x18] sm:$0xff] (!%p213_p2)  ;;  %v273_v11 = vld [vmem:[%s988_s1 + $0xa0] sm:$0xff] (!%p213_p2) }
   0x8   : > { %700 = vmatprep.subr.bf16.mxu0 (!%p213_p2), %v699_v3  ;;  %v274_v12 = vld [vmem:[%s988_s1 + $0xa8] sm:$0xff] (!%p213_p2)  ;;  %v705_v13 = vpack.c.bf16 (!%p213_p2), %v256_v10, %v255_v9  ;;  %v257_v15 = vld [vmem:[%s988_s1 + $0x20] sm:$0xff] (!%p213_p2)  ;;  %v275_v17 = vld [vmem:[%s988_s1 + $0xb0] sm:$0xff] (!%p213_p2) }
   0x9   : > { %702 = vmatpush3.bf16.msra.mxu0 (!%p213_p2), %v701_v7  ;;  %v707_v14 = vpack.c.bf16 (!%p213_p2), %v274_v12, %v273_v11  ;;  %v258_v16 = vld [vmem:[%s988_s1 + $0x28] sm:$0xff] (!%p213_p2)  ;;  %v276_v18 = vld [vmem:[%s988_s1 + $0xb8] sm:$0xff] (!%p213_p2)  ;;  %v259_v21 = vld [vmem:[%s988_s1 + $0x30] sm:$0xff] (!%p213_p2)  ;;  %v762_v11 = vmov (!%p213_p2), 0.0  }
   0xa   : > { %704 = vmatprep.subr.bf16.mxu0 (!%p213_p2), %v703_v8  ;;  %v709_v19 = vpack.c.bf16 (!%p213_p2), %v258_v16, %v257_v15  ;;  %v711_v20 = vpack.c.bf16 (!%p213_p2), %v276_v18, %v275_v17  ;;  %v260_v22 = vld [vmem:[%s988_s1 + $0x38] sm:$0xff] (!%p213_p2)  ;;  %v277_v23 = vld [vmem:[%s988_s1 + $0xc0] sm:$0xff] (!%p213_p2)  ;;  %v278_v24 = vld [vmem:[%s988_s1 + $0xc8] sm:$0xff] (!%p213_p2) }
   0xb   : > { %v713_v27 = vpack.c.bf16 (!%p213_p2), %v260_v22, %v259_v21  ;;  %v715_v28 = vpack.c.bf16 (!%p213_p2), %v278_v24, %v277_v23  ;;  %v261_v29 = vld [vmem:[%s988_s1 + $0x40] sm:$0xff] (!%p213_p2)  ;;  %v262_v30 = vld [vmem:[%s988_s1 + $0x48] sm:$0xff] (!%p213_p2)  ;;  %v279_v31 = vld [vmem:[%s988_s1 + $0xd0] sm:$0xff] (!%p213_p2) }
   0xc   : > { %v280_v32 = vld [vmem:[%s988_s1 + $0xd8] sm:$0xff] (!%p213_p2)  ;;  %v717_v33 = vpack.c.bf16 (!%p213_p2), %v262_v30, %v261_v29  ;;  %v263_v35 = vld [vmem:[%s988_s1 + $0x50] sm:$0xff] (!%p213_p2)  ;;  %v281_v37 = vld [vmem:[%s988_s1 + $0xe0] sm:$0xff] (!%p213_p2) }
   0xd   : > { %s995_s22 = smov (!%p242_p3, %s638_s22), 1  ;;  %706 = vmatpush3.bf16.msra.mxu0 %v705_v13  ;;  %v719_v34 = vpack.c.bf16 %v280_v32, %v279_v31  ;;  %v264_v36 = vld [vmem:[%s988_s1 + $0x58] sm:$0xff]  ;;  %v282_v38 = vld [vmem:[%s988_s1 + $0xe8] sm:$0xff]  ;;  %v265_v41 = vld [vmem:[%s988_s1 + $0x60] sm:$0xff] }
   0xe   : > { %s655_s19 = sshll.u32 %s995_s22, 3  ;;  %s743_s30 = smul.u32 48, %s995_s22  ;;  %708 = vmatprep.subr.bf16.mxu0 %v707_v14  ;;  %v721_v39 = vpack.c.bf16 %v264_v36, %v263_v35  ;;  %v723_v40 = vpack.c.bf16 %v282_v38, %v281_v37  ;;  %v266_v42 = vld [vmem:[%s988_s1 + $0x68] sm:$0xff]  ;;  %v283_v43 = vld [vmem:[%s988_s1 + $0xf0] sm:$0xff]  ;;  %v284_v44 = vld [vmem:[%s988_s1 + $0xf8] sm:$0xff] }
   0xf   : > { %s246_s9 = scalar_lea.vmem %s987_s0, %s655_s19  ;;  %v725_v45 = vpack.c.bf16 %v266_v42, %v265_v41  ;;  %v727_v46 = vpack.c.bf16 %v284_v44, %v283_v43  ;;  %v267_v47 = vld [vmem:[%s988_s1 + $0x70] sm:$0xff]  ;;  %v268_v48 = vld [vmem:[%s988_s1 + $0x78] sm:$0xff]  ;;  %v358_v50 = vld [vmem:[%s989_s2] sm:$0xff] }
  0x10   : > { %s866_s19 = scalar_lea.vmem %s993_s6, %s743_s30  ;;  %v252_v25 = vld [vmem:[%s246_s9] sm:$0xff]  ;;  %v729_v49 = vpack.c.bf16 %v268_v48, %v267_v47  ;;  %696 = vmatprep.mubr.msk.f32.mxu1 %vm362_vm0, %v358_v50  ;;  %v455_v51 = vld [vmem:[%s992_s5 + $0x8] sm:$0xff]  ;;  %v457_v52 = vld [vmem:[%s992_s5 + $0x18] sm:$0xff] }
  0x11   : > { %v286_v26 = vcombine.high %v252_v25, %v252_v25  ;;  %559 = vst [vmem:[%s866_s19] sm:$0xf] %v252_v25  ;;  %710 = vmatpush3.bf16.msra.mxu0 %v709_v19  ;;  %v454_v54 = vld [vmem:[%s992_s5] sm:$0xff]  ;;  %v456_v55 = vld [vmem:[%s992_s5 + $0x10] sm:$0xff]  ;;  %v459_v57 = vld [vmem:[%s992_s5 + $0x28] sm:$0xff]  ;;  %v731_v60 = vpack.c.bf16 %v457_v52, %v455_v51 }
  0x12   : > { %712 = vmatprep.subr.bf16.mxu0 %v711_v20  ;;  %v461_v58 = vld [vmem:[%s992_s5 + $0x38] sm:$0xff]  ;;  %v359_v61 = vld [vmem:[%s989_s2 + $0x8] sm:$0xff]  ;;  %v733_v62 = vpack.c.bf16 %v456_v55, %v454_v54  ;;  %v458_v0 = vld [vmem:[%s992_s5 + $0x20] sm:$0xff] }
  0x13   : > { %352 = vmatprep.mubr.f32.mxu0 %v286_v26  ;;  %560 = vst [vmem:[%s866_s19 + $0x8] sm:$0xf] %v286_v26  ;;  %v735_v63 = vpack.c.bf16 %v461_v58, %v459_v57  ;;  %v460_v1 = vld [vmem:[%s992_s5 + $0x30] sm:$0xff]  ;;  %v463_v3 = vld [vmem:[%s992_s5 + $0x48] sm:$0xff]  ;;  %v465_v4 = vld [vmem:[%s992_s5 + $0x58] sm:$0xff] }
  0x14   : > { %v737_v2 = vpack.c.bf16 %v460_v1, %v458_v0  ;;  %v739_v5 = vpack.c.bf16 %v465_v4, %v463_v3  ;;  %v462_v6 = vld [vmem:[%s992_s5 + $0x40] sm:$0xff]  ;;  %v464_v7 = vld [vmem:[%s992_s5 + $0x50] sm:$0xff]  ;;  %v467_v9 = vld [vmem:[%s992_s5 + $0x68] sm:$0x3] }
  0x15   : > { %714 = vmatpush3.bf16.msra.mxu0 %v713_v27  ;;  %v741_v8 = vpack.c.bf16 %v464_v7, %v462_v6  ;;  %v466_v10 = vld [vmem:[%s992_s5 + $0x60] sm:$0x3]  ;;  %v361_v12 = vld [vmem:[%s990_s3 + $0x8] sm:$0xff] }
  0x16   : > { %716 = vmatprep.subr.bf16.mxu0 %v715_v28  ;;  %v360_v13 = vld [vmem:[%s990_s3] sm:$0xff]  ;;  %v451_v22 = vld [vmem:[%s991_s4 + $0x8] sm:$0xff] }
  0x17   : > { %v450_v18 = vld [vmem:[%s991_s4] sm:$0xff] }
  0x19   : > { %718 = vmatpush3.bf16.msra.mxu0 %v717_v33 }
  0x1a   : > { %720 = vmatprep.subr.bf16.mxu0 %v719_v34 }
  0x1d   : > { %722 = vmatpush3.bf16.msra.mxu0 %v721_v39 }
  0x1e   : > { %724 = vmatprep.subr.bf16.mxu0 %v723_v40 }
  0x21   : > { %726 = vmatpush3.bf16.msra.mxu0 %v725_v45 }
  0x22   : > { %728 = vmatprep.subr.bf16.mxu0 %v727_v46 }
  0x25   : > { %730 = vmatpush3.bf16.msra.mxu0 %v729_v49 }
  0x28   : > { %353 = vmatmul.mubr.f32.vlgmr.msra.gmra.mrb[0].mxu0 %v252_v25 }
  0xfb   : > { %v688_v53 = vpop.f32.mrb[0].mxu0 }
  0xfc   : > { %v689_v56 = vpop.f32.mrb[1].mxu0 }
  0xfd   : > { %v690_v59 = vadd.f32 %v689_v56, %v688_v53 }
  0xff   : > { %694 = vmatprep.subr.msk.mxu1 %vm369_vm1, %v690_v59 }
 0x100   : > { %695 = vmatpush3.msk.msra.mxu1 %vm369_vm1, %v690_v59 }
 0x101   : > { %697 = vmatmul.mubr.msk.f32.vlgmr.msra.gmra.mrb[0].mxu1 %vm362_vm0, %v359_v61  ;;  %732 = vmatprep.subr.bf16.mxu1 %v731_v60 }
 0x102   : > { %734 = vmatpush1.bf16.msra.mxu1 %v733_v62  ;;  %546 = vmatprep.mubr.f32.mxu1 %v762_v11 }
 0x103   : > { %736 = vmatprep.subr.bf16.mxu1 %v735_v63 }
 0x106   : > { %738 = vmatpush1.bf16.msra.mxu1 %v737_v2 }
 0x107   : > { %740 = vmatprep.subr.bf16.mxu1 %v739_v5 }
 0x10a   : > { %742 = vmatpush1.bf16.msra.mxu1 %v741_v8 }
 0x10b   : > { %649 = vmatprep.subr.msk.mxu1 %vm475_vm2, %v467_v9 }
 0x10e   : > { %650 = vmatpush1.msk.msra.mxu1 %vm475_vm2, %v466_v10 }
 0x1d4   : > { %v698_v14 = vpop.f32.mrb[0].mxu1 }
 0x1d5   : > { %v439_v15 = vpop.f32.mrb[1].mxu1  ;;  %v445_v16 = vadd.f32 %v698_v14, %v361_v12 }
 0x1d6   : > { %v440_v17 = vadd.f32 %v439_v15, %v360_v13 }
 0x1d7   : > { %v449_v20 = vmax.f32 %v445_v16, 0.0 }
 0x1d8   : > { %v448_v19 = vmax.f32 %v440_v17, 0.0 }
 0x1d9   : > { %v453_v23 = vmul.f32 %v451_v22, %v449_v20 }
 0x1da   : > { %v452_v21 = vmul.f32 %v450_v18, %v448_v19 }
 0x1dc   : > { %651 = vmatmul.mubr.msk.f32.vlgmr.msra.gmra.mrb[2].mxu1 %vm468_vm3, %v452_v21 }
 0x1dd   : > { %552 = vmatprep.mubr.f32.mxu1 %v762_v11 }
 0x1e0   : > { %652 = vmatmul.mubr.msk.f32.gmra.mrb[4].mxu1 %vm468_vm3, %v453_v23 }
 0x2af   : > { %v548_v24 = vpop.f32.mrb[2].mxu1 }
 0x2b0   : > { %v565_v25 = vrot.slane %v548_v24, 4  ;;  %v550_v26 = vpop.f32.mrb[3].mxu1 }
 0x2b1   : > { %v566_v27 = vrot.slane %v550_v26, 4 }
 0x2b2   : > { %577 = vst [vmem:[%s866_s19] sm:$0xf0] %v565_v25 }
 0x2b3   : > { %578 = vst [vmem:[%s866_s19 + $0x8] sm:$0xf0] %v566_v27  ;;  %v554_v28 = vpop.f32.mrb[4].mxu1 }
 0x2b4   : > { %v567_v29 = vrot.slane %v554_v28, 4  ;;  %v556_v30 = vpop.f32.mrb[5].mxu1 }
 0x2b5   : > { %v569_v31 = vrot.slane %v556_v30, 4 }
 0x2b6   : > { %v568_v32 = vsel %vm369_vm1, %v565_v25, %v567_v29  ;;  %581 = vst [vmem:[%s866_s19 + $0x20] sm:$0xf] %v567_v29 }
 0x2b7   : > { %579 = vst [vmem:[%s866_s19 + $0x10] sm:$0xff] %v568_v32  ;;  %v570_v33 = vsel %vm369_vm1, %v566_v27, %v569_v31  ;;  %582 = vst [vmem:[%s866_s19 + $0x28] sm:$0xf] %v569_v31 }
 0x2b8   : > { %580 = vst [vmem:[%s866_s19 + $0x18] sm:$0xff] %v570_v33 }
 0x2b9 PF: > { %s16_s21 = sadd.s32 1, %s760_s21  }
 0x2ba   : > { %p13_p4 = scmp.ge.s32.totalorder %s16_s21, 4  }
 0x2bc   :  { %15 = sbr.rel (!%p13_p4) target bundleno = 1 (0x1), region = 74 }

</bundles_post_ra>
